<compile_context>
chip_gen: v7x
topology: tpu7x:2x2x1
jax: 0.10.0
libtpu: 0.0.40
codegen_flags: <defaults>
</compile_context>

<pallas_src>
import functools

import jax
import jax.numpy as jnp
from jax.experimental import pallas as pl
from jax.experimental.pallas import tpu as pltpu


# ---------------------------------------------------------------------------
# Host-side weight preparation
# ---------------------------------------------------------------------------
def _banded_conv_weight(w_k, E):
    """Conv2d(1,H,(k,k)) weight -> banded matmul weight.

    w_k: (H, 1, k, k).  Returns Wbig: (k, E, H*Tj) with
      Wbig[di, e, h*Tj + j] = w_k[h, 0, di, e - j]  if 0 <= e - j < k else 0
    so that   conv[i, h*Tj + j] = sum_di  x[i+di, :] @ Wbig[di]
    reproduces the (cross-correlation) Conv2d output.
    """
    H, _, k, _ = w_k.shape
    Tj = E - k + 1
    e_idx = jnp.arange(E)[:, None]          # (E, 1)
    j_idx = jnp.arange(Tj)[None, :]         # (1, Tj)
    d = e_idx - j_idx                       # (E, Tj)
    mask = (d >= 0) & (d < k)
    d_c = jnp.clip(d, 0, k - 1)
    taps = w_k[:, 0, :, :]                  # (H, k, k)
    g = taps[:, :, d_c]                     # (H, k, E, Tj)
    g = jnp.where(mask[None, None, :, :], g, 0.0)
    g = jnp.transpose(g, (1, 2, 0, 3)).reshape(k, E, H * Tj)
    return g.astype(jnp.float32)


def _blockdiag_fc_weight(fc_w_seg, H, n_pad):
    """fc_w_seg: (C, Tj) slice of the FC weight for one conv branch.

    Returns (H*Tj, n_pad) with big[h*Tj + j, h*C + c] = fc_w_seg[c, j]
    (zero elsewhere, zero-padded columns up to n_pad), so the branch's
    pooled row-vector (1, H*Tj) @ big accumulates the FC output laid out as
    n = h*C + c.
    """
    C, Tj = fc_w_seg.shape
    eye = jnp.eye(H, dtype=jnp.float32)
    big = jnp.einsum("xy,cj->xjyc", eye, fc_w_seg.astype(jnp.float32))
    big = big.reshape(H * Tj, H * C)
    return jnp.pad(big, ((0, 0), (0, n_pad - H * C)))


# ---------------------------------------------------------------------------
# Fused kernel: all conv branches + ReLU + max-pool + FC, one batch element
# per grid step.
# ---------------------------------------------------------------------------
def fused_textcnn_kernel(x_ref, *refs, kernels):
    """Refs layout:
      x_ref: (1, S, E)
      per branch k: wbig (k, E, H*Tj), bias (1, H*Tj), fcbig (H*Tj, Npad)
      fc_b:  (1, Npad)
      out:   (1, 1, Npad)
    """
    out_ref = refs[-1]
    fc_b_ref = refs[-2]

    x = x_ref[0]                                    # (S, E)
    S = x.shape[0]
    logits = fc_b_ref[...]                          # (1, Npad), f32

    for idx, k in enumerate(kernels):               # static unrolled loop
        wbig_ref, bias_ref, fcbig_ref = refs[3 * idx: 3 * idx + 3]
        Ti = S - k + 1
        # Shift-and-add conv: k lane-contiguous matmuls, no im2col reshapes.
        conv = jnp.dot(x[0:Ti, :], wbig_ref[0],
                       preferred_element_type=jnp.float32)      # (Ti, H*Tj)
        for di in range(1, k):
            conv = conv + jnp.dot(x[di:di + Ti, :], wbig_ref[di],
                                  preferred_element_type=jnp.float32)
        # Max-pool over the height axis; bias + ReLU hoisted after the max.
        pooled = jnp.max(conv, axis=0, keepdims=True) + bias_ref[...]
        pooled = jnp.maximum(pooled, 0.0)                       # (1, H*Tj)
        # Fused FC contribution of this branch (block-diagonal weight).
        logits = logits + jnp.dot(pooled, fcbig_ref[...],
                                  preferred_element_type=jnp.float32)

    out_ref[0] = logits                              # lane-dense (1, Npad)


# ---------------------------------------------------------------------------
# Wrapper
# ---------------------------------------------------------------------------
def textcnn2_fused_forward(params, x, kernels):
    """Full TextCNN2 forward. x: (B, S, E) float32 -> (B, H, n_class)."""
    B, S, E = x.shape
    H = params[f"conv{kernels[0]}_w"].shape[0]
    C = params["fc_b"].shape[0]
    tjs = [E - k + 1 for k in kernels]
    assert S >= max(kernels), "sequence shorter than largest conv kernel"
    assert sum(tjs) == params["fc_w"].shape[1], "fc in_features mismatch"

    n_pad = ((H * C + 127) // 128) * 128             # lane-dense output width

    inputs = [x.astype(jnp.float32)]
    in_specs = [pl.BlockSpec((1, S, E), lambda b: (b, 0, 0))]

    off = 0
    for k in kernels:
        Tj = E - k + 1
        wbig = _banded_conv_weight(params[f"conv{k}_w"], E)          # (k,E,H*Tj)
        bias_big = jnp.repeat(params[f"conv{k}_b"].astype(jnp.float32),
                              Tj).reshape(1, H * Tj)                 # (1,H*Tj)
        fcbig = _blockdiag_fc_weight(params["fc_w"][:, off:off + Tj],
                                     H, n_pad)                       # (H*Tj,Npad)
        off += Tj
        inputs += [wbig, bias_big, fcbig]
        in_specs += [
            pl.BlockSpec(wbig.shape, lambda b: (0, 0, 0)),
            pl.BlockSpec(bias_big.shape, lambda b: (0, 0)),
            pl.BlockSpec(fcbig.shape, lambda b: (0, 0)),
        ]

    fc_b_big = jnp.zeros((1, n_pad), jnp.float32).at[0, :H * C].set(
        jnp.tile(params["fc_b"].astype(jnp.float32), H))
    inputs.append(fc_b_big)
    in_specs.append(pl.BlockSpec(fc_b_big.shape, lambda b: (0, 0)))

    # TODO(synk): F.dropout(x) in the PyTorch forward defaults to
    # training=True (stochastic); implemented here as identity (inference).
    out = pl.pallas_call(
        functools.partial(fused_textcnn_kernel, kernels=tuple(kernels)),
        out_shape=jax.ShapeDtypeStruct((B, 1, n_pad), jnp.float32),
        grid=(B,),
        in_specs=in_specs,
        out_specs=pl.BlockSpec((1, 1, n_pad), lambda b: (b, 0, 0)),
        compiler_params=pltpu.CompilerParams(
            dimension_semantics=("parallel",)),
    )(*inputs)

    return out[:, 0, :H * C].reshape(B, H, C)


# ---------------------------------------------------------------------------
# Pure-JAX reference (mirrors the PyTorch forward, dropout = identity)
# ---------------------------------------------------------------------------
def text_cnn2_reference(params, x, kernels):
    B, S, E = x.shape
    pooled = []
    for k in kernels:
        w = params[f"conv{k}_w"]                     # (H, 1, k, k)
        b = params[f"conv{k}_b"]                     # (H,)
        H = w.shape[0]
        Ti, Tj = S - k + 1, E - k + 1
        out = jnp.zeros((B, H, Ti, Tj), jnp.float32)
        for di in range(k):
            for dj in range(k):
                patch = x[:, di:di + Ti, dj:dj + Tj]             # (B, Ti, Tj)
                out = out + patch[:, None, :, :] * \
                    w[:, 0, di, dj][None, :, None, None]
        out = out + b[None, :, None, None]
        out = jnp.maximum(out, 0.0)
        pooled.append(jnp.max(out, axis=2))                      # (B, H, Tj)
    feats = jnp.concatenate(pooled, axis=-1)                     # (B, H, Wtot)
    return feats @ params["fc_w"].T + params["fc_b"]             # (B, H, C)


# ---------------------------------------------------------------------------
# Main
# ---------------------------------------------------------------------------
if __name__ == "__main__":
    # Small shapes consistent with the module: the FC requires
    #   sum_k (E - k + 1) == num_hidden * len(kernels)  ->  E = 10 below.
    n_class = 5
    kernels = (2, 3, 4)
    num_hidden = 8
    batch = 2
    seq_len = 12
    width = 10
    assert sum(width - k + 1 for k in kernels) == num_hidden * len(kernels)

    key = jax.random.PRNGKey(0)
    ks = jax.random.split(key, 2 + 2 * len(kernels) + 1)
    params = {
        "fc_w": 0.1 * jax.random.normal(
            ks[0], (n_class, num_hidden * len(kernels)), jnp.float32),
        "fc_b": 0.1 * jax.random.normal(ks[1], (n_class,), jnp.float32),
    }
    for i, k in enumerate(kernels):
        params[f"conv{k}_w"] = 0.3 * jax.random.normal(
            ks[2 + 2 * i], (num_hidden, 1, k, k), jnp.float32)
        params[f"conv{k}_b"] = 0.1 * jax.random.normal(
            ks[3 + 2 * i], (num_hidden,), jnp.float32)

    x = jax.random.normal(ks[-1], (batch, seq_len, width), jnp.float32)

    out = textcnn2_fused_forward(params, x, kernels)
    out = jax.block_until_ready(out)

    ref = text_cnn2_reference(params, x, kernels)
    assert out.shape == (batch, num_hidden, n_class), out.shape
    assert jnp.allclose(out, ref, atol=1e-4, rtol=1e-4), (
        "mismatch vs reference, max abs err "
        f"{float(jnp.max(jnp.abs(out - ref)))}")

    print("KERNEL_OK")
</pallas_src>

<mosaic_0001>
module attributes {stable_mosaic.version = 11 : i64} {
  func.func @fused_textcnn_kernel(%arg0: i32, %arg1: memref<1x12x10xf32, #tpu.memory_space<vmem>>, %arg2: memref<2x10x72xf32, #tpu.memory_space<vmem>>, %arg3: memref<1x72xf32, #tpu.memory_space<vmem>>, %arg4: memref<72x128xf32, #tpu.memory_space<vmem>>, %arg5: memref<3x10x64xf32, #tpu.memory_space<vmem>>, %arg6: memref<1x64xf32, #tpu.memory_space<vmem>>, %arg7: memref<64x128xf32, #tpu.memory_space<vmem>>, %arg8: memref<4x10x56xf32, #tpu.memory_space<vmem>>, %arg9: memref<1x56xf32, #tpu.memory_space<vmem>>, %arg10: memref<56x128xf32, #tpu.memory_space<vmem>>, %arg11: memref<1x128xf32, #tpu.memory_space<vmem>>, %arg12: memref<1x1x128xf32, #tpu.memory_space<vmem>>) attributes {dimension_semantics = [#tpu.dimension_semantics<parallel>], iteration_bounds = array<i64: 2>, scalar_prefetch = 0 : i64, scratch_operands = 0 : i64, tpu.core_type = #tpu.core_type<tc>, window_params = [{transform_indices = @transform_0, window_bounds = array<i64: 1, 12, 10>}, {pipeline_mode = #tpu.pipeline_mode<synchronous>, transform_indices = @transform_1, window_bounds = array<i64: 2, 10, 72>}, {pipeline_mode = #tpu.pipeline_mode<synchronous>, transform_indices = @transform_2, window_bounds = array<i64: 1, 72>}, {pipeline_mode = #tpu.pipeline_mode<synchronous>, transform_indices = @transform_3, window_bounds = array<i64: 72, 128>}, {pipeline_mode = #tpu.pipeline_mode<synchronous>, transform_indices = @transform_4, window_bounds = array<i64: 3, 10, 64>}, {pipeline_mode = #tpu.pipeline_mode<synchronous>, transform_indices = @transform_5, window_bounds = array<i64: 1, 64>}, {pipeline_mode = #tpu.pipeline_mode<synchronous>, transform_indices = @transform_6, window_bounds = array<i64: 64, 128>}, {pipeline_mode = #tpu.pipeline_mode<synchronous>, transform_indices = @transform_7, window_bounds = array<i64: 4, 10, 56>}, {pipeline_mode = #tpu.pipeline_mode<synchronous>, transform_indices = @transform_8, window_bounds = array<i64: 1, 56>}, {pipeline_mode = #tpu.pipeline_mode<synchronous>, transform_indices = @transform_9, window_bounds = array<i64: 56, 128>}, {pipeline_mode = #tpu.pipeline_mode<synchronous>, transform_indices = @transform_10, window_bounds = array<i64: 1, 128>}, {transform_indices = @transform_11, window_bounds = array<i64: 1, 1, 128>}]} {
    %c0 = arith.constant 0 : index
    %c0_0 = arith.constant 0 : index
    %c0_1 = arith.constant 0 : index
    %0 = vector.load %arg1[%c0, %c0_0, %c0_1] : memref<1x12x10xf32, #tpu.memory_space<vmem>>, vector<1x12x10xf32>
    %1 = vector.shape_cast %0 : vector<1x12x10xf32> to vector<12x10xf32>
    %c0_2 = arith.constant 0 : index
    %c0_3 = arith.constant 0 : index
    %2 = vector.load %arg11[%c0_2, %c0_3] : memref<1x128xf32, #tpu.memory_space<vmem>>, vector<1x128xf32>
    %3 = vector.extract_strided_slice %1 {offsets = [0, 0], sizes = [11, 10], strides = [1, 1]} : vector<12x10xf32> to vector<11x10xf32>
    %c0_4 = arith.constant 0 : index
    %c0_5 = arith.constant 0 : index
    %c0_6 = arith.constant 0 : index
    %4 = vector.load %arg2[%c0_4, %c0_5, %c0_6] : memref<2x10x72xf32, #tpu.memory_space<vmem>>, vector<1x10x72xf32>
    %5 = vector.shape_cast %4 : vector<1x10x72xf32> to vector<10x72xf32>
    %cst = arith.constant dense<0.000000e+00> : vector<11x72xf32>
    %6 = tpu.matmul %3, %5, %cst {dimension_numbers = #tpu.dot_dimension_numbers<[1], [0], [0], [1], [0, 0, 1, 1], [], []>} : vector<11x10xf32>, vector<10x72xf32>, vector<11x72xf32> -> vector<11x72xf32>
    %7 = vector.extract_strided_slice %1 {offsets = [1, 0], sizes = [11, 10], strides = [1, 1]} : vector<12x10xf32> to vector<11x10xf32>
    %c1 = arith.constant 1 : index
    %c0_7 = arith.constant 0 : index
    %c0_8 = arith.constant 0 : index
    %8 = vector.load %arg2[%c1, %c0_7, %c0_8] : memref<2x10x72xf32, #tpu.memory_space<vmem>>, vector<1x10x72xf32>
    %9 = vector.shape_cast %8 : vector<1x10x72xf32> to vector<10x72xf32>
    %cst_9 = arith.constant dense<0.000000e+00> : vector<11x72xf32>
    %10 = tpu.matmul %7, %9, %cst_9 {dimension_numbers = #tpu.dot_dimension_numbers<[1], [0], [0], [1], [0, 0, 1, 1], [], []>} : vector<11x10xf32>, vector<10x72xf32>, vector<11x72xf32> -> vector<11x72xf32>
    %11 = arith.addf %6, %10 : vector<11x72xf32>
    %cst_10 = arith.constant dense<0xFF800000> : vector<72xf32>
    %12 = vector.multi_reduction <maximumf>, %11, %cst_10 [0] : vector<11x72xf32> to vector<72xf32>
    %13 = vector.shape_cast %12 : vector<72xf32> to vector<1x72xf32>
    %c0_11 = arith.constant 0 : index
    %c0_12 = arith.constant 0 : index
    %14 = vector.load %arg3[%c0_11, %c0_12] : memref<1x72xf32, #tpu.memory_space<vmem>>, vector<1x72xf32>
    %15 = arith.addf %13, %14 : vector<1x72xf32>
    %cst_13 = arith.constant 0.000000e+00 : f32
    %16 = vector.broadcast %cst_13 : f32 to vector<1x72xf32>
    %17 = arith.maximumf %15, %16 : vector<1x72xf32>
    %c0_14 = arith.constant 0 : index
    %c0_15 = arith.constant 0 : index
    %18 = vector.load %arg4[%c0_14, %c0_15] : memref<72x128xf32, #tpu.memory_space<vmem>>, vector<72x128xf32>
    %cst_16 = arith.constant dense<0.000000e+00> : vector<1x128xf32>
    %19 = tpu.matmul %17, %18, %cst_16 {dimension_numbers = #tpu.dot_dimension_numbers<[1], [0], [0], [1], [0, 0, 1, 1], [], []>} : vector<1x72xf32>, vector<72x128xf32>, vector<1x128xf32> -> vector<1x128xf32>
    %20 = arith.addf %2, %19 : vector<1x128xf32>
    %21 = vector.extract_strided_slice %1 {offsets = [0, 0], sizes = [10, 10], strides = [1, 1]} : vector<12x10xf32> to vector<10x10xf32>
    %c0_17 = arith.constant 0 : index
    %c0_18 = arith.constant 0 : index
    %c0_19 = arith.constant 0 : index
    %22 = vector.load %arg5[%c0_17, %c0_18, %c0_19] : memref<3x10x64xf32, #tpu.memory_space<vmem>>, vector<1x10x64xf32>
    %23 = vector.shape_cast %22 : vector<1x10x64xf32> to vector<10x64xf32>
    %cst_20 = arith.constant dense<0.000000e+00> : vector<10x64xf32>
    %24 = tpu.matmul %21, %23, %cst_20 {dimension_numbers = #tpu.dot_dimension_numbers<[1], [0], [0], [1], [0, 0, 1, 1], [], []>} : vector<10x10xf32>, vector<10x64xf32>, vector<10x64xf32> -> vector<10x64xf32>
    %25 = vector.extract_strided_slice %1 {offsets = [1, 0], sizes = [10, 10], strides = [1, 1]} : vector<12x10xf32> to vector<10x10xf32>
    %c1_21 = arith.constant 1 : index
    %c0_22 = arith.constant 0 : index
    %c0_23 = arith.constant 0 : index
    %26 = vector.load %arg5[%c1_21, %c0_22, %c0_23] : memref<3x10x64xf32, #tpu.memory_space<vmem>>, vector<1x10x64xf32>
    %27 = vector.shape_cast %26 : vector<1x10x64xf32> to vector<10x64xf32>
    %cst_24 = arith.constant dense<0.000000e+00> : vector<10x64xf32>
    %28 = tpu.matmul %25, %27, %cst_24 {dimension_numbers = #tpu.dot_dimension_numbers<[1], [0], [0], [1], [0, 0, 1, 1], [], []>} : vector<10x10xf32>, vector<10x64xf32>, vector<10x64xf32> -> vector<10x64xf32>
    %29 = arith.addf %24, %28 : vector<10x64xf32>
    %30 = vector.extract_strided_slice %1 {offsets = [2, 0], sizes = [10, 10], strides = [1, 1]} : vector<12x10xf32> to vector<10x10xf32>
    %c2 = arith.constant 2 : index
    %c0_25 = arith.constant 0 : index
    %c0_26 = arith.constant 0 : index
    %31 = vector.load %arg5[%c2, %c0_25, %c0_26] : memref<3x10x64xf32, #tpu.memory_space<vmem>>, vector<1x10x64xf32>
    %32 = vector.shape_cast %31 : vector<1x10x64xf32> to vector<10x64xf32>
    %cst_27 = arith.constant dense<0.000000e+00> : vector<10x64xf32>
    %33 = tpu.matmul %30, %32, %cst_27 {dimension_numbers = #tpu.dot_dimension_numbers<[1], [0], [0], [1], [0, 0, 1, 1], [], []>} : vector<10x10xf32>, vector<10x64xf32>, vector<10x64xf32> -> vector<10x64xf32>
    %34 = arith.addf %29, %33 : vector<10x64xf32>
    %cst_28 = arith.constant dense<0xFF800000> : vector<64xf32>
    %35 = vector.multi_reduction <maximumf>, %34, %cst_28 [0] : vector<10x64xf32> to vector<64xf32>
    %36 = vector.shape_cast %35 : vector<64xf32> to vector<1x64xf32>
    %c0_29 = arith.constant 0 : index
    %c0_30 = arith.constant 0 : index
    %37 = vector.load %arg6[%c0_29, %c0_30] : memref<1x64xf32, #tpu.memory_space<vmem>>, vector<1x64xf32>
    %38 = arith.addf %36, %37 : vector<1x64xf32>
    %cst_31 = arith.constant 0.000000e+00 : f32
    %39 = vector.broadcast %cst_31 : f32 to vector<1x64xf32>
    %40 = arith.maximumf %38, %39 : vector<1x64xf32>
    %c0_32 = arith.constant 0 : index
    %c0_33 = arith.constant 0 : index
    %41 = vector.load %arg7[%c0_32, %c0_33] : memref<64x128xf32, #tpu.memory_space<vmem>>, vector<64x128xf32>
    %cst_34 = arith.constant dense<0.000000e+00> : vector<1x128xf32>
    %42 = tpu.matmul %40, %41, %cst_34 {dimension_numbers = #tpu.dot_dimension_numbers<[1], [0], [0], [1], [0, 0, 1, 1], [], []>} : vector<1x64xf32>, vector<64x128xf32>, vector<1x128xf32> -> vector<1x128xf32>
    %43 = arith.addf %20, %42 : vector<1x128xf32>
    %44 = vector.extract_strided_slice %1 {offsets = [0, 0], sizes = [9, 10], strides = [1, 1]} : vector<12x10xf32> to vector<9x10xf32>
    %c0_35 = arith.constant 0 : index
    %c0_36 = arith.constant 0 : index
    %c0_37 = arith.constant 0 : index
    %45 = vector.load %arg8[%c0_35, %c0_36, %c0_37] : memref<4x10x56xf32, #tpu.memory_space<vmem>>, vector<1x10x56xf32>
    %46 = vector.shape_cast %45 : vector<1x10x56xf32> to vector<10x56xf32>
    %cst_38 = arith.constant dense<0.000000e+00> : vector<9x56xf32>
    %47 = tpu.matmul %44, %46, %cst_38 {dimension_numbers = #tpu.dot_dimension_numbers<[1], [0], [0], [1], [0, 0, 1, 1], [], []>} : vector<9x10xf32>, vector<10x56xf32>, vector<9x56xf32> -> vector<9x56xf32>
    %48 = vector.extract_strided_slice %1 {offsets = [1, 0], sizes = [9, 10], strides = [1, 1]} : vector<12x10xf32> to vector<9x10xf32>
    %c1_39 = arith.constant 1 : index
    %c0_40 = arith.constant 0 : index
    %c0_41 = arith.constant 0 : index
    %49 = vector.load %arg8[%c1_39, %c0_40, %c0_41] : memref<4x10x56xf32, #tpu.memory_space<vmem>>, vector<1x10x56xf32>
    %50 = vector.shape_cast %49 : vector<1x10x56xf32> to vector<10x56xf32>
    %cst_42 = arith.constant dense<0.000000e+00> : vector<9x56xf32>
    %51 = tpu.matmul %48, %50, %cst_42 {dimension_numbers = #tpu.dot_dimension_numbers<[1], [0], [0], [1], [0, 0, 1, 1], [], []>} : vector<9x10xf32>, vector<10x56xf32>, vector<9x56xf32> -> vector<9x56xf32>
    %52 = arith.addf %47, %51 : vector<9x56xf32>
    %53 = vector.extract_strided_slice %1 {offsets = [2, 0], sizes = [9, 10], strides = [1, 1]} : vector<12x10xf32> to vector<9x10xf32>
    %c2_43 = arith.constant 2 : index
    %c0_44 = arith.constant 0 : index
    %c0_45 = arith.constant 0 : index
    %54 = vector.load %arg8[%c2_43, %c0_44, %c0_45] : memref<4x10x56xf32, #tpu.memory_space<vmem>>, vector<1x10x56xf32>
    %55 = vector.shape_cast %54 : vector<1x10x56xf32> to vector<10x56xf32>
    %cst_46 = arith.constant dense<0.000000e+00> : vector<9x56xf32>
    %56 = tpu.matmul %53, %55, %cst_46 {dimension_numbers = #tpu.dot_dimension_numbers<[1], [0], [0], [1], [0, 0, 1, 1], [], []>} : vector<9x10xf32>, vector<10x56xf32>, vector<9x56xf32> -> vector<9x56xf32>
    %57 = arith.addf %52, %56 : vector<9x56xf32>
    %58 = vector.extract_strided_slice %1 {offsets = [3, 0], sizes = [9, 10], strides = [1, 1]} : vector<12x10xf32> to vector<9x10xf32>
    %c3 = arith.constant 3 : index
    %c0_47 = arith.constant 0 : index
    %c0_48 = arith.constant 0 : index
    %59 = vector.load %arg8[%c3, %c0_47, %c0_48] : memref<4x10x56xf32, #tpu.memory_space<vmem>>, vector<1x10x56xf32>
    %60 = vector.shape_cast %59 : vector<1x10x56xf32> to vector<10x56xf32>
    %cst_49 = arith.constant dense<0.000000e+00> : vector<9x56xf32>
    %61 = tpu.matmul %58, %60, %cst_49 {dimension_numbers = #tpu.dot_dimension_numbers<[1], [0], [0], [1], [0, 0, 1, 1], [], []>} : vector<9x10xf32>, vector<10x56xf32>, vector<9x56xf32> -> vector<9x56xf32>
    %62 = arith.addf %57, %61 : vector<9x56xf32>
    %cst_50 = arith.constant dense<0xFF800000> : vector<56xf32>
    %63 = vector.multi_reduction <maximumf>, %62, %cst_50 [0] : vector<9x56xf32> to vector<56xf32>
    %64 = vector.shape_cast %63 : vector<56xf32> to vector<1x56xf32>
    %c0_51 = arith.constant 0 : index
    %c0_52 = arith.constant 0 : index
    %65 = vector.load %arg9[%c0_51, %c0_52] : memref<1x56xf32, #tpu.memory_space<vmem>>, vector<1x56xf32>
    %66 = arith.addf %64, %65 : vector<1x56xf32>
    %cst_53 = arith.constant 0.000000e+00 : f32
    %67 = vector.broadcast %cst_53 : f32 to vector<1x56xf32>
    %68 = arith.maximumf %66, %67 : vector<1x56xf32>
    %c0_54 = arith.constant 0 : index
    %c0_55 = arith.constant 0 : index
    %69 = vector.load %arg10[%c0_54, %c0_55] : memref<56x128xf32, #tpu.memory_space<vmem>>, vector<56x128xf32>
    %cst_56 = arith.constant dense<0.000000e+00> : vector<1x128xf32>
    %70 = tpu.matmul %68, %69, %cst_56 {dimension_numbers = #tpu.dot_dimension_numbers<[1], [0], [0], [1], [0, 0, 1, 1], [], []>} : vector<1x56xf32>, vector<56x128xf32>, vector<1x128xf32> -> vector<1x128xf32>
    %71 = arith.addf %43, %70 : vector<1x128xf32>
    %c0_57 = arith.constant 0 : index
    %c0_58 = arith.constant 0 : index
    %c0_59 = arith.constant 0 : index
    %72 = vector.load %arg12[%c0_57, %c0_58, %c0_59] : memref<1x1x128xf32, #tpu.memory_space<vmem>>, vector<1x1x128xf32>
    %73 = vector.shape_cast %72 : vector<1x1x128xf32> to vector<1x128xf32>
    %74 = vector.shape_cast %71 : vector<1x128xf32> to vector<1x1x128xf32>
    tpu.vector_store %arg12[%c0_57, %c0_58, %c0_59], %74 {strides = array<i32>} : memref<1x1x128xf32, #tpu.memory_space<vmem>>, vector<1x1x128xf32>,
    return
  }
  func.func @transform_0(%arg0: i32) -> (i32, i32, i32) {
    %c0_i32 = arith.constant 0 : i32
    %c0_i32_0 = arith.constant 0 : i32
    %c0_i32_1 = arith.constant 0 : i32
    return %arg0, %c0_i32, %c0_i32_0 : i32, i32, i32
  }
  func.func @transform_1(%arg0: i32) -> (i32, i32, i32) {
    %c0_i32 = arith.constant 0 : i32
    %c0_i32_0 = arith.constant 0 : i32
    %c0_i32_1 = arith.constant 0 : i32
    %c0_i32_2 = arith.constant 0 : i32
    return %c0_i32, %c0_i32_0, %c0_i32_1 : i32, i32, i32
  }
  func.func @transform_2(%arg0: i32) -> (i32, i32) {
    %c0_i32 = arith.constant 0 : i32
    %c0_i32_0 = arith.constant 0 : i32
    %c0_i32_1 = arith.constant 0 : i32
    return %c0_i32, %c0_i32_0 : i32, i32
  }
  func.func @transform_3(%arg0: i32) -> (i32, i32) {
    %c0_i32 = arith.constant 0 : i32
    %c0_i32_0 = arith.constant 0 : i32
    %c0_i32_1 = arith.constant 0 : i32
    return %c0_i32, %c0_i32_0 : i32, i32
  }
  func.func @transform_4(%arg0: i32) -> (i32, i32, i32) {
    %c0_i32 = arith.constant 0 : i32
    %c0_i32_0 = arith.constant 0 : i32
    %c0_i32_1 = arith.constant 0 : i32
    %c0_i32_2 = arith.constant 0 : i32
    return %c0_i32, %c0_i32_0, %c0_i32_1 : i32, i32, i32
  }
  func.func @transform_5(%arg0: i32) -> (i32, i32) {
    %c0_i32 = arith.constant 0 : i32
    %c0_i32_0 = arith.constant 0 : i32
    %c0_i32_1 = arith.constant 0 : i32
    return %c0_i32, %c0_i32_0 : i32, i32
  }
  func.func @transform_6(%arg0: i32) -> (i32, i32) {
    %c0_i32 = arith.constant 0 : i32
    %c0_i32_0 = arith.constant 0 : i32
    %c0_i32_1 = arith.constant 0 : i32
    return %c0_i32, %c0_i32_0 : i32, i32
  }
  func.func @transform_7(%arg0: i32) -> (i32, i32, i32) {
    %c0_i32 = arith.constant 0 : i32
    %c0_i32_0 = arith.constant 0 : i32
    %c0_i32_1 = arith.constant 0 : i32
    %c0_i32_2 = arith.constant 0 : i32
    return %c0_i32, %c0_i32_0, %c0_i32_1 : i32, i32, i32
  }
  func.func @transform_8(%arg0: i32) -> (i32, i32) {
    %c0_i32 = arith.constant 0 : i32
    %c0_i32_0 = arith.constant 0 : i32
    %c0_i32_1 = arith.constant 0 : i32
    return %c0_i32, %c0_i32_0 : i32, i32
  }
  func.func @transform_9(%arg0: i32) -> (i32, i32) {
    %c0_i32 = arith.constant 0 : i32
    %c0_i32_0 = arith.constant 0 : i32
    %c0_i32_1 = arith.constant 0 : i32
    return %c0_i32, %c0_i32_0 : i32, i32
  }
  func.func @transform_10(%arg0: i32) -> (i32, i32) {
    %c0_i32 = arith.constant 0 : i32
    %c0_i32_0 = arith.constant 0 : i32
    %c0_i32_1 = arith.constant 0 : i32
    return %c0_i32, %c0_i32_0 : i32, i32
  }
  func.func @transform_11(%arg0: i32) -> (i32, i32, i32) {
    %c0_i32 = arith.constant 0 : i32
    %c0_i32_0 = arith.constant 0 : i32
    %c0_i32_1 = arith.constant 0 : i32
    return %arg0, %c0_i32, %c0_i32_0 : i32, i32, i32
  }
}

</mosaic_0001>

<bundles_post_ra>
// kernel: tpu_custom_call.1
= control target key start
LH: loop header
LB: loop body
LE: loop exit
PB: predicated region body
PF: predicated region fallthrough
CT: control target
= control target key end

     0   :  { %s2356_s0 = inlined_call_operand.vmem [shape: f32[2,12,10], index: 0, kind: input, shape index: {}]   ;;  %s2357_s1 = inlined_call_operand.vmem [shape: f32[2,10,72], index: 1, kind: input, shape index: {}]   ;;  %s2358_s2 = inlined_call_operand.vmem [shape: f32[1,72], index: 2, kind: input, shape index: {}]   ;;  %s2359_s3 = inlined_call_operand.vmem [shape: f32[72,128], index: 3, kind: input, shape index: {}]   ;;  %s2360_s4 = inlined_call_operand.vmem [shape: f32[3,10,64], index: 4, kind: input, shape index: {}]   ;;  %s2361_s5 = inlined_call_operand.vmem [shape: f32[1,64], index: 5, kind: input, shape index: {}]   ;;  %s2362_s6 = inlined_call_operand.vmem [shape: f32[64,128], index: 6, kind: input, shape index: {}]   ;;  %s2363_s7 = inlined_call_operand.vmem [shape: f32[4,10,56], index: 7, kind: input, shape index: {}]   ;;  %s2364_s8 = inlined_call_operand.vmem [shape: f32[1,56], index: 8, kind: input, shape index: {}]   ;;  %s2365_s9 = inlined_call_operand.vmem [shape: f32[56,128], index: 9, kind: input, shape index: {}]   ;;  %s2366_s10 = inlined_call_operand.vmem [shape: f32[1,128], index: 10, kind: input, shape index: {}]   ;;  %s2367_s11 = inlined_call_operand.hbm [shape: f32[2,1,128], index: 11, kind: output, shape index: {}]  }
   0x1   :  { %2368 = sst [smem:[#allocation5_spill]] %s2356_s0 }
   0x2   :  { %16 = vsyncpa [#allocation3], 0 }
   0x3   :  { %18 = vsyncpa [#allocation3 + $0x1], 0  ;;  %s2019_s17 = smov 0   ;;  %s2021_s18 = smov 0  }
   0x4   :  { %s2023_s19 = smov 0   ;;  %s2025_s20 = smov 0  }
   0x5 LB: > { %s2040_s21 = sadd.s32 4294967295, %s1952_s20   ;;  %s1508_s22 = sadd.s32 4294967294, %s1952_s20   ;;  %s1952_s20 = sphi %s2025_s20, %s2377_s20   ;;  %s1948_s19 = sphi %s2023_s19, %s2376_s19   ;;  %s1944_s18 = sphi %s2021_s18, %s2375_s18   ;;  %s1940_s17 = sphi %s2019_s17, %s2374_s17  }
   0x6   : > { %s2044_s23 = sadd.s32 1, %s1952_s20   ;;  %s267_s24 = sadd.s32 1, %s1948_s19 }
   0x7   : > { %s264_s25 = ssub.s32 %s1952_s20, %s2044_s23  ;;  %p277_p0 = scmp.ne.s32.totalorder %s1948_s19, %s1944_s18 }
   0x8   : > { %p265_p1 = scmp.eq.s32.totalorder %s264_s25, 0  ;;  %p278_p2 = scmp.eq.s32.totalorder %s2040_s21, 1 }
   0x9   : > { %p283_p3 = scmp.ne.s32.totalorder %s1944_s18, %s1940_s17  ;;  %p284_p4 = scmp.eq.s32.totalorder %s1508_s22, 1 }
   0xa   : > { %s2055_s26 = scalar_select %p265_p1, %s1948_s19, %s267_s24  }
   0xb   : > { %p2057_p5 = por %p278_p2, %p277_p0  ;;  %p2061_p6 = por %p284_p4, %p283_p3 }
   0xc   : > { %p1511_p7 = scmp.ge.s32.totalorder %s1952_s20, 1  ;;  %p340_p8 = scmp.lt.s32.totalorder %s1952_s20, 3 }
   0xe   : > { %p341_p9 = pnand %p1511_p7, %p340_p8 }
   0xf   : > { %v1514_v0 = vld [vmem:[%s2357_s1 + $0x10] sm:$0xff] (!%p341_p9)  ;;  %v1515_v1 = vld [vmem:[%s2357_s1 + $0x18] sm:$0x3] (!%p341_p9)  ;;  %vm403_vm0 = vcmask (!%p341_p9), 1041408   ;;  %p379_p10 = scmp.lt.s32.totalorder (!%p341_p9), %s2040_s21, 1  ;;  %vm1954_vm1 = vmmov (!%p341_p9), 1  }
  0x10   : > { %344 = sbr.rel (%p341_p9) target bundleno = 548 (0x224), region = 64  ;;  %v1743_v2 = vpack.c.bf16 (!%p341_p9), %v1515_v1, %v1514_v0  ;;  %vm2074_vm2 = vmpackc.low (!%p341_p9), %vm403_vm0, %vm1954_vm1  ;;  %v387_v4 = vld [vmem:[%s2357_s1] sm:$0xff] (!%p341_p9)  ;;  %v388_v5 = vld [vmem:[%s2357_s1 + $0x8] sm:$0x3] (!%p341_p9)  ;;  %s2373_s0 = sld [smem:[#allocation5_spill]] (!%p341_p9)  ;;  %vm394_vm3 = vcmask (!%p341_p9), 1046528  }
  0x11   : > { %v1749_v6 = vpack.c.bf16 (!%p341_p9), %v388_v5, %v387_v4  ;;  %v1523_v7 = vld [vmem:[%s2360_s4 + $0x10] sm:$0xff] (!%p341_p9)  ;;  %v1524_v10 = vld [vmem:[%s2360_s4 + $0x18] sm:$0x3] (!%p341_p9)  ;;  %vm398_vm4 = vcmask (!%p341_p9), 80896   ;;  %v661_v15 = vld [vmem:[%s2360_s4] sm:$0xff] (!%p341_p9)  ;;  %vm825_vm5 = vcmask (!%p341_p9), 1045504  }
  0x12   : > { %1745 = vmatprep.subr.msk.bf16.mxu0 (!%p341_p9), %vm2074_vm2, %v1743_v2  ;;  %v1767_v14 = vpack.c.bf16 (!%p341_p9), %v1524_v10, %v1523_v7  ;;  %v662_v16 = vld [vmem:[%s2360_s4 + $0x8] sm:$0x3] (!%p341_p9)  ;;  %v1531_v18 = vld [vmem:[%s2360_s4 + $0x20] sm:$0xff] (!%p341_p9)  ;;  %v1537_v23 = vld [vmem:[%s2363_s7 + $0x10] sm:$0xff] (!%p341_p9)  ;;  %vm1256_vm6 = vcmask (!%p341_p9), 1044480   ;;  %v1955_v42 = vmov (!%p341_p9), 0.0|0.0  }
  0x13   : > { %1748 = vmatpush3.bf16.msk.msra.mxu0 (!%p341_p9), %vm2074_vm2, %v1743_v2  ;;  %v1773_v17 = vpack.c.bf16 (!%p341_p9), %v662_v16, %v661_v15  ;;  %v1532_v19 = vld [vmem:[%s2360_s4 + $0x28] sm:$0x3] (!%p341_p9)  ;;  %v1538_v24 = vld [vmem:[%s2363_s7 + $0x18] sm:$0x3] (!%p341_p9)  ;;  %v1009_v27 = vld [vmem:[%s2363_s7] sm:$0xff] (!%p341_p9)  ;;  %1755 = vmatprep.subr.bf16.mxu1 (!%p341_p9), %v1955_v42  ;;  %vm1956_vm7 = vmmov (!%p341_p9), 0  }
  0x14   : > { %1751 = vmatprep.subr.msk.bf16.mxu0 (!%p341_p9), %vm2074_vm2, %v1749_v6  ;;  %v1779_v20 = vpack.c.bf16 (!%p341_p9), %v1532_v19, %v1531_v18  ;;  %v1797_v26 = vpack.c.bf16 (!%p341_p9), %v1538_v24, %v1537_v23  ;;  %v1010_v28 = vld [vmem:[%s2363_s7 + $0x8] sm:$0x3] (!%p341_p9)  ;;  %v1545_v30 = vld [vmem:[%s2363_s7 + $0x20] sm:$0xff] (!%p341_p9)  ;;  %v1550_v33 = vld [vmem:[%s2363_s7 + $0x30] sm:$0xff] (!%p341_p9)  ;;  %v1957_v52 = vmov (!%p341_p9), 0.0   ;;  %vm566_vm8 = vcmask (!%p341_p9), 583680  }
  0x15   : > { %v1803_v29 = vpack.c.bf16 (!%p341_p9), %v1010_v28, %v1009_v27  ;;  %v1546_v31 = vld [vmem:[%s2363_s7 + $0x28] sm:$0x3] (!%p341_p9)  ;;  %v1551_v34 = vld [vmem:[%s2363_s7 + $0x38] sm:$0x3] (!%p341_p9)  ;;  %v578_v39 = vld [vmem:[%s2359_s3] sm:$0xff] (!%p341_p9)  ;;  %1655 = vmatprep.mubr.msk.f32.mxu1 (!%p341_p9), %vm1956_vm7, %v1957_v52  ;;  %vm564_vm9 = vcmask (!%p341_p9), 588800  }
  0x16   : > { %v1809_v32 = vpack.c.bf16 (!%p341_p9), %v1546_v31, %v1545_v30  ;;  %v1815_v35 = vpack.c.bf16 (!%p341_p9), %v1551_v34, %v1550_v33  ;;  %v579_v40 = vld [vmem:[%s2359_s3 + $0x8] sm:$0xff] (!%p341_p9)  ;;  %v580_v43 = vld [vmem:[%s2359_s3 + $0x10] sm:$0xff] (!%p341_p9)  ;;  %v581_v44 = vld [vmem:[%s2359_s3 + $0x18] sm:$0xff] (!%p341_p9)  ;;  %vm915_vm10 = vcmask (!%p341_p9), 517120   ;;  %vm913_vm11 = vcmask (!%p341_p9), 523264   ;;  %s377_s15 = sand.u32 (!%p341_p9), 1, %s1944_s18  }
  0x17   : > { %s380_s24 = scalar_select %p379_p10, %s2040_s21, 1  ;;  %v1756_v41 = vpack.c.bf16 %v579_v40, %v578_v39  ;;  %v1759_v45 = vpack.c.bf16 %v581_v44, %v580_v43  ;;  %v582_v46 = vld [vmem:[%s2359_s3 + $0x20] sm:$0xff]  ;;  %v583_v47 = vld [vmem:[%s2359_s3 + $0x28] sm:$0xff]  ;;  %v584_v49 = vld [vmem:[%s2359_s3 + $0x30] sm:$0xff]  ;;  %vm1346_vm12 = vcmask 450560   ;;  %vm1344_vm13 = vcmask 457728  }
  0x18   : > { %v1762_v48 = vpack.c.bf16 %v583_v47, %v582_v46  ;;  %v585_v50 = vld [vmem:[%s2359_s3 + $0x38] sm:$0xff]  ;;  %v586_v53 = vld [vmem:[%s2359_s3 + $0x40] sm:$0xff]  ;;  %v928_v3 = vld [vmem:[%s2362_s6 + $0x8] sm:$0xff]  ;;  %s1441_s14 = scalar_lea.sflag [#allocation3], %s377_s15 }
  0x19   : > { %s1559_s25 = sshll.u32 %s380_s24, 4  ;;  %1757 = vmatpush3.bf16.msra.mxu1 %v1756_v41  ;;  %v1765_v51 = vpack.c.bf16 %v585_v50, %v584_v49  ;;  %v575_v0 = vld [vmem:[%s2358_s2] sm:$0x1]  ;;  %v929_v7 = vld [vmem:[%s2362_s6 + $0x10] sm:$0xff]  ;;  %v932_v16 = vld [vmem:[%s2362_s6 + $0x28] sm:$0xff]  ;;  %s1556_s24 = sshll.u32 %s2040_s21, 4 }
  0x1a   : > { %s383_s12 = scalar_lea.vmem %s2373_s0, %s1559_s25  ;;  %1758 = vmatprep.subr.bf16.mxu1 %v1955_v42  ;;  %v927_v2 = vld [vmem:[%s2362_s6] sm:$0xff]  ;;  %v1360_v33 = vld [vmem:[%s2365_s9 + $0x10] sm:$0xff]  ;;  %v1361_v34 = vld [vmem:[%s2365_s9 + $0x18] sm:$0xff]  ;;  %s378_s25 = scalar_lea.vmem [#allocation2], %s377_s15 }
  0x1b   : > { %v2097_v8 = vld [vmem:[%s383_s12] sm:$0xff]  ;;  %v2099_v9 = vld [vmem:[%s383_s12 + $0x8] sm:$0xf]  ;;  %v1786_v5 = vpack.c.bf16 %v928_v3, %v927_v2  ;;  %s1453_s29 = sshll.u32 %s378_s25, 4  ;;  %s2314_s13 = scalar_lea.hbm %s2367_s11, %s1556_s24  ;;  %s2316_s29 = int_to_ptr.vmem [resolvable:$true] %s1453_s29 }
  0x1c   : > { %v395_v11 = vrot.slane %v2097_v8, 1  ;;  %v396_v12 = vrot.slane %v2099_v9, 1  ;;  %v826_v21 = vrot.slane %v2097_v8, 2  ;;  %v827_v22 = vrot.slane %v2099_v9, 2  ;;  %v931_v15 = vld [vmem:[%s2362_s6 + $0x20] sm:$0xff]  ;;  %s1890_s16 = scalar_lea.vmem %s2316_s29, 16 }
  0x1d   : > { %v1257_v36 = vrot.slane %v2097_v8, 3  ;;  %v1258_v37 = vrot.slane %v2099_v9, 3  ;;  %1760 = vmatpush3.bf16.msra.mxu1 %v1759_v45  ;;  %v1792_v18 = vpack.c.bf16 %v932_v16, %v931_v15  ;;  %v1358_v28 = vld [vmem:[%s2365_s9] sm:$0xff]  ;;  %v1364_v45 = vld [vmem:[%s2365_s9 + $0x30] sm:$0xff]  ;;  %p1891_p11 = scmp.ne.s32.totalorder %s2316_s29, %s1890_s16  ;;  %s1958_s21 = smov [#allocation2]  }
  0x1e   : > { %v397_v13 = vsel %vm394_vm3, %v395_v11, %v396_v12  ;;  %v828_v25 = vsel %vm825_vm5, %v826_v21, %v827_v22  ;;  %1761 = vmatprep.subr.bf16.mxu1 %v1955_v42  ;;  %v934_v21 = vld [vmem:[%s2362_s6 + $0x38] sm:$0xff]  ;;  %v1355_v50 = vld [vmem:[%s2364_s8] sm:$0x1]  ;;  %s1894_s22 = sshll.u32 %s1958_s21, 4  ;;  %s1895_s22 = int_to_ptr.vmem [resolvable:$false] %s1894_s22 }
  0x1f   : > { %1627 = vmatprep.mubr.msk.f32.mxu0 %vm398_vm4, %v397_v13  ;;  %v1259_v38 = vsel %vm1256_vm6, %v1257_v36, %v1258_v37  ;;  %v1362_v36 = vld [vmem:[%s2365_s9 + $0x20] sm:$0xff]  ;;  %p1892_p12 = pnand %p1891_p11, %p2057_p5  ;;  %s1896_s0 = scalar_lea.vmem %s1895_s22, 32 }
  0x20   : > { %1628 = vmatmul.mubr.msk.f32.vlgmr.msra.gmra.mrb[0].mxu0 %vm398_vm4, %v396_v12  ;;  %p1897_p0 = scmp.lt.s32.totalorder %s2316_s29, %s1895_s22  ;;  %p1898_p1 = scmp.lt.s32.totalorder %s1896_s0, %s1890_s16 }
  0x21   : > { %1754 = vmatpush3.bf16.msk.msra.mxu0 %vm2074_vm2, %v1749_v6  ;;  %1634 = vmatprep.mubr.msk.f32.mxu0 %vm398_vm4, %v2097_v8  ;;  %p1893_p13 = pneg %p1892_p12 }
  0x22   : > { %1769 = vmatprep.subr.msk.bf16.mxu0 %vm2074_vm2, %v1767_v14  ;;  %1763 = vmatpush3.bf16.msra.mxu1 %v1762_v48  ;;  %p1899_p2 = por %p1898_p1, %p1897_p0 }
  0x23   : > { %1764 = vmatprep.subr.bf16.mxu1 %v1955_v42 }
  0x24   : > { %p1900_p3 = pnand %p1899_p2, %p1893_p13 }
  0x26   : > { %1766 = vmatpush3.bf16.msra.mxu1 %v1765_v51 }
  0x27   : > { %1653 = vmatprep.subr.mxu1 %v1957_v52 }
  0x28   : > { %1635 = vmatmul.mubr.msk.f32.vlgmr.msra.gmra.mrb[0].mxu0 %vm398_vm4, %v2099_v9 }
  0x29   : > { %1772 = vmatpush3.bf16.msk.msra.mxu0 %vm2074_vm2, %v1767_v14  ;;  %1662 = vmatprep.mubr.msk.f32.mxu0 %vm398_vm4, %v397_v13 }
  0x2a   : > { %1775 = vmatprep.subr.msk.bf16.mxu0 %vm2074_vm2, %v1773_v17  ;;  %1654 = vmatpush3.msra.mxu1 %v586_v53 }
  0x2b   : > { %1785 = vmatprep.subr.bf16.mxu1 %v1955_v42 }
  0x2c   : > { %1663 = vmatmul.mubr.msk.f32.vlgmr.msra.gmra.mrb[2].mxu0 %vm398_vm4, %v396_v12 }
  0x2d   : > { %1778 = vmatpush3.bf16.msk.msra.mxu0 %vm2074_vm2, %v1773_v17  ;;  %1669 = vmatprep.mubr.msk.f32.mxu0 %vm398_vm4, %v2097_v8 }
  0x2e   : > { %1781 = vmatprep.subr.msk.bf16.mxu0 %vm2074_vm2, %v1779_v20 }
  0x34   : > { %1670 = vmatmul.mubr.msk.f32.vlgmr.msra.gmra.mrb[2].mxu0 %vm398_vm4, %v2099_v9 }
  0x35   : > { %1784 = vmatpush3.bf16.msk.msra.mxu0 %vm2074_vm2, %v1779_v20  ;;  %1676 = vmatprep.mubr.msk.f32.mxu0 %vm398_vm4, %v828_v25  ;;  %v933_v20 = vld [vmem:[%s2362_s6 + $0x30] sm:$0xff] }
  0x36   : > { %1799 = vmatprep.subr.msk.bf16.mxu0 %vm2074_vm2, %v1797_v26  ;;  %v1795_v23 = vpack.c.bf16 %v934_v21, %v933_v20 }
  0x3c   : > { %1677 = vmatmul.mubr.msk.f32.vlgmr.msra.gmra.mrb[2].mxu0 %vm398_vm4, %v827_v22 }
  0x3d   : > { %1802 = vmatpush3.bf16.msk.msra.mxu0 %vm2074_vm2, %v1797_v26  ;;  %1702 = vmatprep.mubr.msk.f32.mxu0 %vm398_vm4, %v397_v13  ;;  %v924_v26 = vld [vmem:[%s2361_s5] sm:$0x1] }
  0x3e   : > { %1805 = vmatprep.subr.msk.bf16.mxu0 %vm2074_vm2, %v1803_v29 }
  0x40   : > { %1703 = vmatmul.mubr.msk.f32.vlgmr.msra.gmra.mrb[4].mxu0 %vm398_vm4, %v396_v12 }
  0x41   : > { %1808 = vmatpush3.bf16.msk.msra.mxu0 %vm2074_vm2, %v1803_v29  ;;  %1709 = vmatprep.mubr.msk.f32.mxu0 %vm398_vm4, %v2097_v8  ;;  %v930_v8 = vld [vmem:[%s2362_s6 + $0x18] sm:$0xff]  ;;  %v1359_v29 = vld [vmem:[%s2365_s9 + $0x8] sm:$0xff] }
  0x42   : > { %1811 = vmatprep.subr.msk.bf16.mxu0 %vm2074_vm2, %v1809_v32  ;;  %v1789_v13 = vpack.c.bf16 %v930_v8, %v929_v7  ;;  %v1822_v31 = vpack.c.bf16 %v1359_v29, %v1358_v28 }
  0x48   : > { %1710 = vmatmul.mubr.msk.f32.vlgmr.msra.gmra.mrb[4].mxu0 %vm398_vm4, %v2099_v9 }
  0x49   : > { %1814 = vmatpush3.bf16.msk.msra.mxu0 %vm2074_vm2, %v1809_v32  ;;  %1716 = vmatprep.mubr.msk.f32.mxu0 %vm398_vm4, %v828_v25 }
  0x4a   : > { %1817 = vmatprep.subr.msk.bf16.mxu0 %vm2074_vm2, %v1815_v35 }
  0x50   : > { %1717 = vmatmul.mubr.msk.f32.vlgmr.msra.gmra.mrb[4].mxu0 %vm398_vm4, %v827_v22 }
  0x51   : > { %1820 = vmatpush3.bf16.msk.msra.mxu0 %vm2074_vm2, %v1815_v35  ;;  %1723 = vmatprep.mubr.msk.f32.mxu0 %vm398_vm4, %v1259_v38  ;;  %v1825_v35 = vpack.c.bf16 %v1361_v34, %v1360_v33 }
  0x58   : > { %1724 = vmatmul.mubr.msk.f32.vlgmr.msra.gmra.mrb[4].mxu0 %vm398_vm4, %v1258_v37  ;;  %v1363_v37 = vld [vmem:[%s2365_s9 + $0x28] sm:$0xff] }
  0x59   : > { %v1828_v38 = vpack.c.bf16 %v1363_v37, %v1362_v36 }
  0xfb   : > { %v1636_v54 = vpop.f32.mrb[0].mxu0 }
  0xfc   : > { %v567_v55 = vsel %vm566_vm8, %v1636_v54, -inf  ;;  %v555_v56 = vpop.f32.mrb[1].mxu0 }
  0xfd   : > { %v565_v57 = vsel %vm564_vm9, %v555_v56, -inf }
  0xfe   : > { %v568_v58 = vmax.f32 %v565_v57, %v567_v55 }
 0x100   : > { %v569_v59 = vrot.slane %v568_v58, 4 }
 0x102   : > { %v570_v60 = vmax.f32 %v568_v58, %v569_v59 }
 0x104   : > { %v571_v61 = vrot.slane %v570_v60, 2 }
 0x106   : > { %v572_v62 = vmax.f32 %v570_v60, %v571_v61 }
 0x108   : > { %v573_v63 = vrot.slane %v572_v62, 1 }
 0x10a   : > { %v574_v1 = vmax.f32 %v572_v62, %v573_v63 }
 0x10c   : > { %v576_v4 = vadd.f32 %v575_v0, %v574_v1 }
 0x10e   : > { %v577_v6 = vmax.f32 %v576_v4, 0.0 }
 0x10f   : > { %v1678_v9 = vpop.f32.mrb[2].mxu0 }
 0x110   : > { %v916_v10 = vsel %vm915_vm10, %v1678_v9, -inf  ;;  %1656 = vmatmul.mubr.msk.f32.vlgmr.msra.gmra.mrb[0].mxu1 %vm564_vm9, %v577_v6  ;;  %v902_v11 = vpop.f32.mrb[3].mxu0 }
 0x111   : > { %v914_v12 = vsel %vm913_vm11, %v902_v11, -inf  ;;  %1787 = vmatpush3.bf16.msra.mxu1 %v1786_v5  ;;  %1695 = vmatprep.mubr.msk.f32.mxu1 %vm1956_vm7, %v1957_v52 }
 0x112   : > { %v917_v14 = vmax.f32 %v914_v12, %v916_v10  ;;  %1788 = vmatprep.subr.bf16.mxu1 %v1955_v42 }
 0x114   : > { %v918_v17 = vrot.slane %v917_v14, 4 }
 0x115   : > { %1790 = vmatpush3.bf16.msra.mxu1 %v1789_v13 }
 0x116   : > { %v919_v19 = vmax.f32 %v917_v14, %v918_v17  ;;  %1791 = vmatprep.subr.bf16.mxu1 %v1955_v42 }
 0x118   : > { %v920_v22 = vrot.slane %v919_v19, 2 }
 0x119   : > { %1793 = vmatpush3.bf16.msra.mxu1 %v1792_v18 }
 0x11a   : > { %v921_v24 = vmax.f32 %v919_v19, %v920_v22  ;;  %1794 = vmatprep.subr.bf16.mxu1 %v1955_v42 }
 0x11c   : > { %v922_v25 = vrot.slane %v921_v24, 1 }
 0x11d   : > { %1796 = vmatpush3.bf16.msra.mxu1 %v1795_v23 }
 0x11e   : > { %v923_v27 = vmax.f32 %v921_v24, %v922_v25  ;;  %1821 = vmatprep.subr.bf16.mxu1 %v1955_v42 }
 0x120   : > { %v925_v30 = vadd.f32 %v924_v26, %v923_v27 }
 0x122   : > { %v926_v32 = vmax.f32 %v925_v30, 0.0 }
 0x124   : > { %1696 = vmatmul.mubr.msk.f32.vlgmr.msra.gmra.mrb[0].mxu1 %vm913_vm11, %v926_v32 }
 0x125   : > { %1823 = vmatpush3.bf16.msra.mxu1 %v1822_v31  ;;  %1740 = vmatprep.mubr.msk.f32.mxu1 %vm1956_vm7, %v1957_v52 }
 0x126   : > { %1824 = vmatprep.subr.bf16.mxu1 %v1955_v42 }
 0x129   : > { %1826 = vmatpush3.bf16.msra.mxu1 %v1825_v35 }
 0x12a   : > { %1827 = vmatprep.subr.bf16.mxu1 %v1955_v42 }
 0x12b   : > { %v1725_v39 = vpop.f32.mrb[4].mxu0 }
 0x12c   : > { %v1347_v40 = vsel %vm1346_vm12, %v1725_v39, -inf  ;;  %v1333_v41 = vpop.f32.mrb[5].mxu0 }
 0x12d   : > { %v1345_v43 = vsel %vm1344_vm13, %v1333_v41, -inf  ;;  %1829 = vmatpush3.bf16.msra.mxu1 %v1828_v38 }
 0x12e   : > { %v1348_v44 = vmax.f32 %v1345_v43, %v1347_v40  ;;  %1738 = vmatprep.subr.mxu1 %v1957_v52  ;;  %v386_v52 = vld [vmem:[%s2366_s10] sm:$0x1] }
 0x130   : > { %v1349_v46 = vrot.slane %v1348_v44, 4 }
 0x131   : > { %1739 = vmatpush3.msra.mxu1 %v1364_v45 }
 0x132   : > { %v1350_v47 = vmax.f32 %v1348_v44, %v1349_v46 }
 0x134   : > { %v1351_v48 = vrot.slane %v1350_v47, 2 }
 0x136   : > { %v1352_v42 = vmax.f32 %v1350_v47, %v1351_v48 }
 0x138   : > { %v1353_v49 = vrot.slane %v1352_v42, 1 }
 0x13a   : > { %v1354_v51 = vmax.f32 %v1352_v42, %v1353_v49 }
 0x13c   : > { %v1356_v53 = vadd.f32 %v1355_v50, %v1354_v51 }
 0x13e   : > { %v1357_v54 = vmax.f32 %v1356_v53, 0.0 }
 0x140   : > { %1741 = vmatmul.mubr.msk.f32.vlgmr.msra.gmra.mrb[0].mxu1 %vm1344_vm13, %v1357_v54 }
 0x213   : > { %v1434_v55 = vpop.f32.mrb[0].mxu1 }
 0x214   : > { %v1830_v56 = vadd.f32 %v1434_v55, %v386_v52  ;;  %v1742_v57 = vpop.f32.mrb[1].mxu1 }
 0x216   : > { %1439 = vst [vmem:[%s378_s25] sm:$0x1] %v1830_v56 }
 0x217   : > { %1903 = shalt.err (!%p1900_p3)
}
 0x218   : > { %s1904_s15 = scalar_lea.hbm %s2314_s13, 16  ;;  %s1908_s30 = scalar_lea.hbm %s2367_s11, 32 }
 0x219   : > { %p1905_p4 = scmp.ne.s32.totalorder %s2314_s13, %s1904_s15  ;;  %p1909_p9 = scmp.lt.u32.totalorder %s2314_s13, %s2367_s11 }
 0x21a   : > { %p1910_p10 = scmp.lt.u32.totalorder %s1908_s30, %s1904_s15  ;;  %p1912_p12 = scmp.lt.u32.totalorder %s1904_s15, %s2314_s13 }
 0x21b   : > { %p1906_p7 = pnand %p1905_p4, %p2057_p5 }
 0x21c   : > { %p1911_p11 = por %p1910_p10, %p1909_p9 }
 0x21d   : > { %p1907_p8 = pneg %p1906_p7 }
 0x21e   : > { %p1913_p13 = por %p1912_p12, %p1911_p11 }
 0x220   : > { %p1914_p0 = pnand %p1913_p13, %p1907_p8 }
 0x222   : > { %1917 = shalt.err (!%p1914_p0)
}
 0x223   : > { %1847 = dma.vmem_to_hbm [thread:$0]  (%p2057_p5), %s2316_s29, 16, %s2314_s13, %s1441_s14  }
 0x224 PF: > { %p1853_p1 = scmp.ge.s32.totalorder %s1952_s20, 2  ;;  %s1465_s0 = sand.u32 1, %s1940_s17  }
 0x225   : > { %s1466_s16 = scalar_lea.sflag [#allocation3], %s1465_s0 }
 0x226   : > { %p1850_p2 = pnand %p1853_p1, %p2061_p6 }
 0x228   : > { %1935 = dma.done.wait (!%p1850_p2), %s1466_s16, 16  }
 0x229   : > { %1937 = vsyncadd (!%p1850_p2), %s1466_s16, 4294967280  ;;  %p21_p3 = scmp.ge.s32.totalorder %s2044_s23, 4   ;;  %s2374_s17 = smov %s1944_s18 }
 0x22a   : > { %s2375_s18 = smov %s1948_s19  ;;  %s2376_s19 = smov %s2055_s26 }
 0x22b   : > { %s2377_s20 = smov %s2044_s23  ;;  %23 = sbr.rel (!%p21_p3) target bundleno = 5 (0x5), region = 105 }
 0x232   :  { %1470 = vsyncpa [#allocation3], 1 }
 0x233   :  { %1472 = vsyncpa [#allocation3 + $0x1], 1 }

</bundles_post_ra>
